<compile_context>
chip_gen: v5e
topology: v5e:2x2
jax: 0.10.0
libtpu: 0.0.40
codegen_flags: <defaults>
</compile_context>

<pallas_src>
import numpy as np

import jax
import jax.numpy as jnp
from jax.experimental import pallas as pl
from jax.experimental.pallas import tpu as pltpu


def _round_up(n: int, m: int) -> int:
    return ((n + m - 1) // m) * m


def _sublane(dtype) -> int:
    """Native second-minor tile size: 8 for 4-byte, 16 for 2-byte, 32 for 1-byte."""
    it = jnp.dtype(dtype).itemsize
    if it >= 4:
        return 8
    return 32 // it


def _padded2d(rows: int, cols: int, dtype) -> int:
    """VMEM bytes of a (rows, cols) array after (sublane, lane) layout padding."""
    it = jnp.dtype(dtype).itemsize
    return _round_up(max(rows, 1), _sublane(dtype)) * _round_up(max(cols, 1), 128) * it


def _vmem_capacity_bytes() -> int:
    """Generation-aware VMEM capacity (128 MiB v5e/v6e, 64 MiB per-core v7x)."""
    try:
        cap = int(pltpu.get_tpu_info().vmem_capacity_bytes)
        if cap > 0:
            return cap
    except Exception:
        pass
    return 64 << 20  # v7x-safe fallback


def _choose_tb(B, F, D, x_dtype, out_dtype, s_dtype, compute_dtype,
               p_pad, chunk, budget):
    """Pick the batch-tile size TB from *padded* tile sizes against the VMEM budget."""
    # Per-batch-row bytes that scale with TB (double-buffered input & output tiles).
    in_row = (_round_up(F, _sublane(x_dtype)) * _round_up(D, 128)
              * jnp.dtype(x_dtype).itemsize)
    out_row = p_pad * jnp.dtype(out_dtype).itemsize
    per_row = 2 * in_row + 2 * out_row

    # TB-independent VMEM: selection matrix buffers + per-chunk temporaries.
    s_bytes = 2 * _padded2d(F * F, p_pad, s_dtype)        # worst case: double-buffered S
    temp = (chunk * _padded2d(F, D, compute_dtype)        # cast x chunk
            + chunk * _padded2d(F, F, jnp.float32)        # (chunk, F, F) f32 Gram
            + chunk * _padded2d(F, F, compute_dtype)      # Gram cast (bf16 path)
            + _padded2d(chunk, F * F, compute_dtype)      # flattened relayout copy
            + _padded2d(chunk, p_pad, jnp.float32))       # selection-matmul accumulator
    fixed = s_bytes + temp + (4 << 20)                    # headroom for Mosaic scratch

    tb = (budget - fixed) // max(per_row, 1)
    tb = max(8, min(int(tb), 4096))
    tb = (tb // 8) * 8

    # Keep >= 2 grid steps whenever the batch allows it, so the "parallel" batch
    # axis can be sharded across both v7x TensorCores.
    half_b = max(8, _round_up(_round_up(B, 8) // 2, 8))
    return max(8, min(tb, half_b))


def _make_fm_kernel(f: int, chunk: int, nchunks: int, compute_dtype):
    def kernel(x_ref, s_ref, o_ref):
        # x_ref: (TB, F, D) batch tile; s_ref: (F*F, P_pad) static 0/1 selection
        # matrix; o_ref: (TB, P_pad) lane-dense output slab.
        s = s_ref[...]  # already stored in compute_dtype; hoisted out of chunk loop

        def compute_chunk(start):
            xb = x_ref[pl.ds(start, chunk), :, :].astype(compute_dtype)   # (chunk,F,D)
            # Batched x @ x^T: contract last dims, batch over dim 0 (MXU, f32 acc,
            # no explicit transpose).
            inter = jax.lax.dot_general(
                xb, xb,
                dimension_numbers=(((2,), (2,)), ((0,), (0,))),
                preferred_element_type=jnp.float32)                        # (chunk,F,F)
            # Fused upper-triangular gather: (chunk, F*F) @ (F*F, P_pad).
            # TODO(synk): if profiling shows this MXU-bound (large F, small D), swap
            # for two thin one-hot gathers + VPU multiply / XLU reduce to drop the
            # O(F^4) S matrix and the ~P_pad/D x extra MACs (Mosaic does not lower
            # multi-contracting-dim dot_general, so the flatten+matmul form is kept).
            flat = inter.astype(compute_dtype).reshape(chunk, f * f)
            packed = jnp.dot(flat, s, preferred_element_type=jnp.float32)  # (chunk,P_pad)
            o_ref[pl.ds(start, chunk), :] = packed.astype(o_ref.dtype)

        if nchunks == 1:
            compute_chunk(0)
        else:
            def body(c, carry):
                compute_chunk(pl.multiple_of(c * chunk, chunk))
                return carry
            jax.lax.fori_loop(0, nchunks, body, 0, unroll=(nchunks <= 4))

    return kernel


def fm_layer(x: jax.Array, *, tb: int | None = None, chunk: int | None = None,
             use_bf16_mxu: bool | None = None, pad_output: bool = False) -> jax.Array:
    """Pallas implementation of FMLayer.forward.

    Args:
      x: (B, F, D) field embeddings.
      tb: batch tile size (auto-chosen from VMEM budget if None).
      chunk: in-kernel row chunk size (bounds on-chip temporaries).
      use_bf16_mxu: cast MXU operands to bf16 (f32 accumulation). Default: only
        when x is already bf16, keeping exact f32 parity for f32 inputs.
      pad_output: return the lane-padded (B, P_pad) slab instead of slicing to P
        (saves an HBM copy when the consumer can take the padded layout).
    Returns:
      (B, F*(F-1)//2) upper-triangular pairwise inner products, dtype of x.
    """
    B, F, D = x.shape
    P = F * (F - 1) // 2
    p_pad = _round_up(max(P, 1), 128)

    if use_bf16_mxu is None:
        use_bf16_mxu = (x.dtype == jnp.bfloat16)
    compute_dtype = jnp.bfloat16 if use_bf16_mxu else jnp.float32

    cap = _vmem_capacity_bytes()
    tile_budget = int(cap * 0.60)
    vmem_limit = int(cap * 0.85)

    if chunk is None:
        chunk = 256 if F <= 16 else 128
    chunk = max(8, (int(chunk) // 8) * 8)

    if tb is None:
        tb = _choose_tb(B, F, D, x.dtype, x.dtype, compute_dtype, compute_dtype,
                        p_pad, chunk, tile_budget)
    else:
        tb = max(8, (int(tb) // 8) * 8)

    chunk = min(chunk, tb)
    tb = max(chunk, (tb // chunk) * chunk)
    nchunks = tb // chunk

    b_pad = _round_up(B, tb)
    x_p = jnp.pad(x, ((0, b_pad - B), (0, 0), (0, 0))) if b_pad != B else x

    # Static 0/1 selection matrix: flat index f*F + g  ->  pair index p (f < g).
    iu, ju = np.triu_indices(F, k=1)
    s_np = np.zeros((F * F, p_pad), dtype=np.float32)
    if P > 0:
        s_np[iu * F + ju, np.arange(P)] = 1.0
    s = jnp.asarray(s_np, dtype=compute_dtype)   # 0/1 is exact in bf16 too

    kernel = _make_fm_kernel(F, chunk, nchunks, compute_dtype)

    def call(s_spec):
        return pl.pallas_call(
            kernel,
            out_shape=jax.ShapeDtypeStruct((b_pad, p_pad), x.dtype),
            grid_spec=pltpu.PrefetchScalarGridSpec(
                num_scalar_prefetch=0,
                grid=(b_pad // tb,),
                in_specs=[pl.BlockSpec((tb, F, D), lambda b: (b, 0, 0)), s_spec],
                out_specs=pl.BlockSpec((tb, p_pad), lambda b: (b, 0)),
            ),
            compiler_params=pltpu.CompilerParams(
                dimension_semantics=("parallel",),
                vmem_limit_bytes=vmem_limit,
            ),
        )(x_p, s)

    s_idx = lambda b: (0, 0)
    spec_candidates = []
    try:
        # Constant index_map -> single-buffer the selection matrix (halves its VMEM).
        spec_candidates.append(
            pl.BlockSpec((F * F, p_pad), s_idx, pipeline_mode=pl.Buffered(1)))
    except Exception:
        pass
    spec_candidates.append(pl.BlockSpec((F * F, p_pad), s_idx))  # default double-buffer

    out, err = None, None
    for sp in spec_candidates:
        try:
            out = call(sp)
            break
        except Exception as e:      # fall back to default buffering if unsupported
            err = e
    if out is None:
        raise err

    if pad_output:
        return out[:B]              # keep lane-padded columns for fused consumers
    return out[:B, :P]


def fm_layer_ref(x: jax.Array) -> jax.Array:
    """Pure-JAX reference mirroring the PyTorch module."""
    inter = jnp.matmul(x, jnp.swapaxes(x, -2, -1))
    iu, ju = jnp.triu_indices(x.shape[1], k=1)
    return inter[:, iu, ju].reshape(x.shape[0], -1)


if __name__ == "__main__":
    # Small, deterministic example: batch=2, num_field=8, embed_dim=32.
    key = jax.random.PRNGKey(0)
    B, F, D = 2, 8, 32
    x = jax.random.normal(key, (B, F, D), dtype=jnp.float32)

    out = jax.block_until_ready(fm_layer(x))
    ref = fm_layer_ref(x)

    assert out.shape == (B, F * (F - 1) // 2), out.shape
    assert jnp.allclose(out, ref, atol=1e-4, rtol=1e-4), "mismatch vs reference"

    print("KERNEL_OK")
</pallas_src>

<mosaic_0001>
module attributes {stable_mosaic.version = 11 : i64} {
  func.func @kernel(%arg0: i32, %arg1: memref<8x8x32xf32, #tpu.memory_space<vmem>>, %arg2: memref<64x128xf32, #tpu.memory_space<vmem>>, %arg3: memref<8x128xf32, #tpu.memory_space<vmem>>) attributes {dimension_semantics = [#tpu.dimension_semantics<parallel>], iteration_bounds = array<i64: 1>, scalar_prefetch = 0 : i64, scratch_operands = 0 : i64, tpu.core_type = #tpu.core_type<tc>, window_params = [{transform_indices = @transform_0, window_bounds = array<i64: 8, 8, 32>}, {pipeline_mode = #tpu.pipeline_mode<synchronous>, transform_indices = @transform_1, window_bounds = array<i64: 64, 128>}, {transform_indices = @transform_2, window_bounds = array<i64: 8, 128>}]} {
    %c0 = arith.constant 0 : index
    %c0_0 = arith.constant 0 : index
    %0 = vector.load %arg2[%c0, %c0_0] : memref<64x128xf32, #tpu.memory_space<vmem>>, vector<64x128xf32>
    %c0_1 = arith.constant 0 : index
    %c0_2 = arith.constant 0 : index
    %c0_3 = arith.constant 0 : index
    %1 = vector.load %arg1[%c0_1, %c0_2, %c0_3] : memref<8x8x32xf32, #tpu.memory_space<vmem>>, vector<8x8x32xf32>
    %cst = arith.constant dense<0.000000e+00> : vector<8x8x8xf32>
    %2 = tpu.matmul %1, %1, %cst {dimension_numbers = #tpu.dot_dimension_numbers<[2], [2], [1], [1], [0, 0, 0, 1, 1, 1], [0], [0]>} : vector<8x8x32xf32>, vector<8x8x32xf32>, vector<8x8x8xf32> -> vector<8x8x8xf32>
    %3 = vector.shape_cast %2 : vector<8x8x8xf32> to vector<8x64xf32>
    %cst_4 = arith.constant dense<0.000000e+00> : vector<8x128xf32>
    %4 = tpu.matmul %3, %0, %cst_4 {dimension_numbers = #tpu.dot_dimension_numbers<[1], [0], [0], [1], [0, 0, 1, 1], [], []>} : vector<8x64xf32>, vector<64x128xf32>, vector<8x128xf32> -> vector<8x128xf32>
    %c0_5 = arith.constant 0 : index
    %c0_6 = arith.constant 0 : index
    %5 = vector.load %arg3[%c0_5, %c0_6] : memref<8x128xf32, #tpu.memory_space<vmem>>, vector<8x128xf32>
    tpu.vector_store %arg3[%c0_5, %c0_6], %4 {strides = array<i32>} : memref<8x128xf32, #tpu.memory_space<vmem>>, vector<8x128xf32>,
    return
  }
  func.func @transform_0(%arg0: i32) -> (i32, i32, i32) {
    %c0_i32 = arith.constant 0 : i32
    %c0_i32_0 = arith.constant 0 : i32
    %c0_i32_1 = arith.constant 0 : i32
    return %arg0, %c0_i32, %c0_i32_0 : i32, i32, i32
  }
  func.func @transform_1(%arg0: i32) -> (i32, i32) {
    %c0_i32 = arith.constant 0 : i32
    %c0_i32_0 = arith.constant 0 : i32
    %c0_i32_1 = arith.constant 0 : i32
    return %c0_i32, %c0_i32_0 : i32, i32
  }
  func.func @transform_2(%arg0: i32) -> (i32, i32) {
    %c0_i32 = arith.constant 0 : i32
    %c0_i32_0 = arith.constant 0 : i32
    return %arg0, %c0_i32 : i32, i32
  }
}

module attributes {stable_mosaic.version = 11 : i64} {
  func.func @kernel(%arg0: i32, %arg1: memref<8x8x32xf32, #tpu.memory_space<vmem>>, %arg2: memref<64x128xf32, #tpu.memory_space<vmem>>, %arg3: memref<8x128xf32, #tpu.memory_space<vmem>>) attributes {dimension_semantics = [#tpu.dimension_semantics<parallel>], iteration_bounds = array<i64: 1>, scalar_prefetch = 0 : i64, scratch_operands = 0 : i64, tpu.core_type = #tpu.core_type<tc>, window_params = [{transform_indices = @transform_0, window_bounds = array<i64: 8, 8, 32>}, {pipeline_mode = #tpu.pipeline_mode<synchronous>, transform_indices = @transform_1, window_bounds = array<i64: 64, 128>}, {transform_indices = @transform_2, window_bounds = array<i64: 8, 128>}]} {
    %c0 = arith.constant 0 : index
    %c0_0 = arith.constant 0 : index
    %0 = vector.load %arg2[%c0, %c0_0] : memref<64x128xf32, #tpu.memory_space<vmem>>, vector<64x128xf32>
    %c0_1 = arith.constant 0 : index
    %c0_2 = arith.constant 0 : index
    %c0_3 = arith.constant 0 : index
    %1 = vector.load %arg1[%c0_1, %c0_2, %c0_3] : memref<8x8x32xf32, #tpu.memory_space<vmem>>, vector<8x8x32xf32>
    %cst = arith.constant dense<0.000000e+00> : vector<8x8x8xf32>
    %2 = tpu.matmul %1, %1, %cst {dimension_numbers = #tpu.dot_dimension_numbers<[2], [2], [1], [1], [0, 0, 0, 1, 1, 1], [0], [0]>} : vector<8x8x32xf32>, vector<8x8x32xf32>, vector<8x8x8xf32> -> vector<8x8x8xf32>
    %3 = vector.shape_cast %2 : vector<8x8x8xf32> to vector<8x64xf32>
    %cst_4 = arith.constant dense<0.000000e+00> : vector<8x128xf32>
    %4 = tpu.matmul %3, %0, %cst_4 {dimension_numbers = #tpu.dot_dimension_numbers<[1], [0], [0], [1], [0, 0, 1, 1], [], []>} : vector<8x64xf32>, vector<64x128xf32>, vector<8x128xf32> -> vector<8x128xf32>
    %c0_5 = arith.constant 0 : index
    %c0_6 = arith.constant 0 : index
    %5 = vector.load %arg3[%c0_5, %c0_6] : memref<8x128xf32, #tpu.memory_space<vmem>>, vector<8x128xf32>
    tpu.vector_store %arg3[%c0_5, %c0_6], %4 {strides = array<i32>} : memref<8x128xf32, #tpu.memory_space<vmem>>, vector<8x128xf32>,
    return
  }
  func.func @transform_0(%arg0: i32) -> (i32, i32, i32) {
    %c0_i32 = arith.constant 0 : i32
    %c0_i32_0 = arith.constant 0 : i32
    %c0_i32_1 = arith.constant 0 : i32
    return %arg0, %c0_i32, %c0_i32_0 : i32, i32, i32
  }
  func.func @transform_1(%arg0: i32) -> (i32, i32) {
    %c0_i32 = arith.constant 0 : i32
    %c0_i32_0 = arith.constant 0 : i32
    %c0_i32_1 = arith.constant 0 : i32
    return %c0_i32, %c0_i32_0 : i32, i32
  }
  func.func @transform_2(%arg0: i32) -> (i32, i32) {
    %c0_i32 = arith.constant 0 : i32
    %c0_i32_0 = arith.constant 0 : i32
    return %arg0, %c0_i32 : i32, i32
  }
}

</mosaic_0001>

<bundles_post_ra>
// kernel: tpu_custom_call.1
= control target key start
LH: loop header
LB: loop body
LE: loop exit
PB: predicated region body
PF: predicated region fallthrough
CT: control target
= control target key end

     0   :  { %7 = vsyncpa [#allocation3], 0  ;;  %s631_s0 = inlined_call_operand.hbm [shape: f32[8,8,32], index: 0, kind: input, shape index: {}]   ;;  %s632_s1 = inlined_call_operand.hbm [shape: f32[64,128], index: 1, kind: input, shape index: {}]   ;;  %s633_s2 = inlined_call_operand.hbm [shape: f32[8,128], index: 2, kind: output, shape index: {}]  }
   0x1   :  { %8 = vsyncpa [#allocation6], 0 }
   0x2   :  { %9 = vsyncpa [#allocation4], 0  ;;  %s14_s11 = sshll.u32 %s631_s0, 4  ;;  %s550_s12 = smov [#allocation2]   ;;  %s15_s11 = int_to_ptr.hbm [resolvable:$true] %s14_s11 }
   0x3   :  { %s16_s13 = sshll.u32 %s550_s12, 4  ;;  %s27_s16 = sshll.u32 %s632_s1, 4  ;;  %s17_s13 = int_to_ptr.vmem [resolvable:$true] %s16_s13  ;;  %s28_s16 = int_to_ptr.hbm [resolvable:$true] %s27_s16 }
   0x4   :  { %s551_s17 = smov 128   ;;  %s552_s18 = smov 8  }
   0x5   :  { %22 = dma.hbm_to_vmem [thread:$0]  %s15_s11, 1024, %s17_s13, [#allocation3], %s551_s17, %s551_s17, %s552_s18  }
   0x6   :  { %s553_s19 = smov [#allocation5]  }
   0x7   :  { %s29_s20 = sshll.u32 %s553_s19, 4  ;;  %s30_s20 = int_to_ptr.vmem [resolvable:$true] %s29_s20 }
   0x8   :  { %35 = dma.hbm_to_vmem [thread:$0]  %s28_s16, 1024, %s30_s20, [#allocation6], %s551_s17, %s551_s17, %s552_s18  }
   0x9   :  { %544 = dma.done.wait [#allocation3], 1024  }
   0xa   :  { %545 = vsyncadd [#allocation3], 4294966272 }
   0xb   :  { %546 = dma.done.wait [#allocation6], 1024  }
   0xc   :  { %547 = vsyncadd [#allocation6], 4294966272  ;;  %vm60_vm0 = vcmask 261120   ;;  %v52_v0 = vld [vmem:[#allocation2] sm:$0xff]  ;;  %v54_v1 = vld [vmem:[#allocation2 + $0x10] sm:$0xff]  ;;  %vm246_vm1 = vcmask 1047556  }
   0xd   :  { %v55_v2 = vld [vmem:[#allocation2 + $0x18] sm:$0xff]  ;;  %442 = vmatpush.xpose.msk.msra.mxu1 %vm60_vm0, %v52_v0  ;;  %446 = vmatpush.xpose.msk.msra.mxu2 %vm60_vm0, %v54_v1  ;;  %v53_v3 = vld [vmem:[#allocation2 + $0x8] sm:$0xff]  ;;  %v58_v5 = vld [vmem:[#allocation2 + $0x30] sm:$0xff]  ;;  %v554_v9 = vmov 1983009808   ;;  %s556_s0 = smov 24  }
   0xe   :  { %v59_v4 = vld [vmem:[#allocation2 + $0x38] sm:$0xff]  ;;  %448 = vmatpush.xpose.msk.msra.mxu3 %vm60_vm0, %v55_v2  ;;  %v57_v6 = vld [vmem:[#allocation2 + $0x28] sm:$0xff]  ;;  %v56_v7 = vld [vmem:[#allocation2 + $0x20] sm:$0xff]  ;;  %v251_v10 = vunpack.c.l.s4 %v554_v9  ;;  %v555_v22 = vmov 1934713408   ;;  %s557_s1 = smov 40  }
   0xf   :  { %450 = vmatpush.xpose.msk.msra.mxu0 %vm60_vm0, %v56_v7  ;;  %v299_v23 = vunpack.c.l.s4 %v555_v22  ;;  %s558_s21 = smov 32   ;;  %s559_s22 = smov 16   ;;  %v51_v22 = vld [vmem:[#allocation5 + $0x38] sm:$0xff]  ;;  %vm386_vm2 = vcmask 64512   ;;  %vm388_vm3 = vcmask 130048   ;;  %vm390_vm4 = vcmask 195584  }
  0x10   :  { %443 = vmatmul.msk.f32.vlgmr.msra.gmra.mxu1 %vm60_vm0, %v52_v0  ;;  %447 = vmatmul.msk.f32.vlgmr.msra.gmra.mxu2 %vm60_vm0, %v54_v1  ;;  %v252_v14 = vunpack.c.0.s8 %v251_v10  ;;  %s560_s23 = smov 48   ;;  %s561_s24 = smov 56   ;;  %vm393_vm5 = vcmask 326656   ;;  %vm395_vm6 = vcmask 392192   ;;  %vm397_vm7 = vcmask 457728  }
  0x11   :  { %444 = vmatpush.xpose.msk.msrb.mxu1 %vm60_vm0, %v53_v3  ;;  %454 = vmatpush.xpose.msk.msrb.mxu2 %vm60_vm0, %v58_v5  ;;  %v300_v37 = vunpack.c.0.s8 %v299_v23  ;;  %v50_v23 = vld [vmem:[#allocation5 + $0x30] sm:$0xff]  ;;  %vm399_vm8 = vcmask 523264   ;;  %s562_s25 = smov [#allocation7]   ;;  %s431_s29 = sshll.u32 %s633_s2, 4  ;;  %s432_s29 = int_to_ptr.hbm [resolvable:$true] %s431_s29 }
  0x12   :  { %456 = vmatpush.xpose.msk.msrb.mxu3 %vm60_vm0, %v59_v4  ;;  %451 = vmatmul.msk.f32.vlgmr.msra.gmra.mxu0 %vm60_vm0, %v56_v7  ;;  %s429_s26 = sshll.u32 %s562_s25, 4  ;;  %s430_s26 = int_to_ptr.vmem [resolvable:$true] %s429_s26 }
  0x13   :  { %449 = vmatmul.msk.f32.vlgmr.msra.gmra.mxu3 %vm60_vm0, %v55_v2  ;;  %411 = vmatpush.msrb.mxu0 %v51_v22 }
  0x15   :  { %452 = vmatpush.xpose.msk.msra.mxu1 %vm60_vm0, %v57_v6  ;;  %412 = vmatpush.msrb.mxu0 %v50_v23 }
  0x18   :  { %445 = vmatmul.msk.f32.vlgmr.msrb.gmra.mxu1 %vm60_vm0, %v53_v3  ;;  %455 = vmatmul.msk.f32.vlgmr.msrb.gmra.mxu2 %vm60_vm0, %v58_v5 }
  0x1b   :  { %457 = vmatmul.msk.f32.vlgmr.msrb.gmra.mxu3 %vm60_vm0, %v59_v4 }
  0x20   :  { %453 = vmatmul.msk.f32.vlgmr.msra.gmra.mxu1 %vm60_vm0, %v57_v6 }
  0x8d   :  { %v81_v8 = vpop.f32.mrf.mxu1 }
  0x8e   :  { %v248_v24 = vrot.slane %v81_v8, 4 }
  0x8f   :  { %v173_v17 = vpop.f32.mrf.mxu0 }
  0x90   :  { %v272_v27 = vrot.slane %v173_v17, 4 }
  0x93   :  { %v127_v11 = vpop.f32.mrf.mxu2 }
  0x94   :  { %v245_v12 = vrot.slane %v127_v11, 4  ;;  %v249_v30 = vsel %vm246_vm1, %v127_v11, %v248_v24  ;;  %v49_v24 = vld [vmem:[#allocation5 + $0x28] sm:$0xff] }
  0x95   :  { %v104_v16 = vpop.f32.mrf.mxu1  ;;  %v257_v38 = vperm.slane %v249_v30, %v252_v14  ;;  %413 = vmatpush.msrb.mxu0 %v49_v24 }
  0x96   :  { %v150_v13 = vpop.f32.mrf.mxu3  ;;  %v247_v18 = vsel %vm246_vm1, %v245_v12, %v81_v8  ;;  %v260_v19 = vrot.slane %v104_v16, 4 }
  0x97   :  { %v258_v15 = vrot.slane %v150_v13, 4  ;;  %v253_v20 = vperm.slane %v247_v18, %v252_v14  ;;  %v308_v10 = vrot.slane %v257_v38, 4 }
  0x98   :  { %v261_v25 = vsel %vm246_vm1, %v150_v13, %v260_v19 }
  0x99   :  { %v259_v21 = vsel %vm246_vm1, %v258_v15, %v104_v16  ;;  %v296_v28 = vrot.slane %v253_v20, 4  ;;  %v269_v29 = vperm.slane %v261_v25, %v252_v14  ;;  %v48_v25 = vld [vmem:[#allocation5 + $0x20] sm:$0xff] }
  0x9a   :  { %v265_v26 = vperm.slane %v259_v21, %v252_v14  ;;  %414 = vmatpush.msrb.mxu0 %v48_v25 }
  0x9b   :  { %v306_v32 = vrot.slane %v269_v29, 4  ;;  %v219_v33 = vpop.f32.mrf.mxu2 }
  0x9c   :  { %v294_v31 = vrot.slane %v265_v26, 4  ;;  %v270_v34 = vrot.slane %v219_v33, 4  ;;  %v273_v35 = vsel %vm246_vm1, %v219_v33, %v272_v27  ;;  %v297_v39 = vsel %vm246_vm1, %v265_v26, %v296_v28  ;;  %v47_v26 = vld [vmem:[#allocation5 + $0x18] sm:$0xff]  ;;  %v46_v27 = vld [vmem:[#allocation5 + $0x10] sm:$0xff]  ;;  %v45_v28 = vld [vmem:[#allocation5 + $0x8] sm:$0xff] }
  0x9d   :  { %v281_v40 = vperm.slane %v273_v35, %v252_v14  ;;  %v196_v42 = vpop.f32.mrf.mxu1  ;;  %v307_v48 = vsel %vm246_vm1, %v306_v32, %v257_v38  ;;  %v305_v51 = vperm.slane %v297_v39, %v300_v37  ;;  %415 = vmatpush.msrb.mxu0 %v47_v26 }
  0x9e   :  { %v242_v36 = vpop.f32.mrf.mxu3  ;;  %v271_v43 = vsel %vm246_vm1, %v270_v34, %v173_v17  ;;  %v284_v44 = vrot.slane %v196_v42, 4  ;;  %v295_v45 = vsel %vm246_vm1, %v294_v31, %v253_v20  ;;  %v313_v57 = vperm.slane %v307_v48, %v300_v37 }
  0x9f   :  { %v282_v41 = vrot.slane %v242_v36, 4  ;;  %v277_v46 = vperm.slane %v271_v43, %v252_v14  ;;  %v332_v53 = vrot.slane %v281_v40, 4  ;;  %v301_v55 = vperm.slane %v295_v45, %v300_v37  ;;  %416 = vmatpush.msrb.mxu0 %v46_v27 }
  0xa0   :  { %v285_v49 = vsel %vm246_vm1, %v242_v36, %v284_v44  ;;  %v348_v61 = vrot.slane %v305_v51, 4  ;;  %v352_v5 = vrot.slane %v313_v57, 4 }
  0xa1   :  { %v283_v47 = vsel %vm246_vm1, %v282_v41, %v196_v42  ;;  %v320_v52 = vrot.slane %v277_v46, 4  ;;  %v293_v54 = vperm.slane %v285_v49, %v252_v14  ;;  %v344_v0 = vrot.slane %v301_v55, 4  ;;  %417 = vmatpush.msrb.mxu0 %v45_v28 }
  0xa2   :  { %v289_v50 = vperm.slane %v283_v47, %v252_v14  ;;  %v309_v14 = vsel %vm246_vm1, %v269_v29, %v308_v10  ;;  %v44_v29 = vld [vmem:[#allocation5] sm:$0xff] }
  0xa3   :  { %v330_v58 = vrot.slane %v293_v54, 4  ;;  %v333_v2 = vsel %vm246_vm1, %v293_v54, %v332_v53  ;;  %v317_v17 = vperm.slane %v309_v14, %v300_v37  ;;  %418 = vmatpush.msrb.mxu0 %v44_v29 }
  0xa4   :  { %v318_v56 = vrot.slane %v289_v50, 4  ;;  %v321_v59 = vsel %vm246_vm1, %v289_v50, %v320_v52  ;;  %v341_v9 = vperm.slane %v333_v2, %v300_v37 }
  0xa5   :  { %v329_v60 = vperm.slane %v321_v59, %v300_v37  ;;  %v331_v1 = vsel %vm246_vm1, %v330_v58, %v281_v40  ;;  %v356_v20 = vrot.slane %v317_v17, 4 }
  0xa6   :  { %v319_v62 = vsel %vm246_vm1, %v318_v56, %v277_v46  ;;  %v337_v4 = vperm.slane %v331_v1, %v300_v37  ;;  %v354_v15 = vrot.slane %v341_v9, 4 }
  0xa7   :  { %v325_v63 = vperm.slane %v319_v62, %v300_v37  ;;  %v349_v3 = vsel %vm246_vm1, %v329_v60, %v348_v61  ;;  %v346_v13 = vrot.slane %v329_v60, 4  ;;  %v357_v21 = vsel %vm246_vm1, %v341_v9, %v356_v20 }
  0xa8   :  { %367 = vrot.lane.b32.xlu1 %v349_v3, %s556_s0  ;;  %v353_v8 = vsel %vm246_vm1, %v337_v4, %v352_v5  ;;  %v350_v12 = vrot.slane %v337_v4, 4  ;;  %v355_v19 = vsel %vm246_vm1, %v354_v15, %v317_v17 }
  0xa9   :  { %v345_v6 = vsel %vm246_vm1, %v325_v63, %v344_v0  ;;  %v342_v7 = vrot.slane %v325_v63, 4  ;;  %375 = vrot.lane.b32.xlu2 %v353_v8, %s557_s1  ;;  %v347_v18 = vsel %vm246_vm1, %v346_v13, %v305_v51 }
  0xaa   :  { %359 = vrot.lane.b32.xlu0 %v345_v6, %s552_s18  ;;  %v351_v16 = vsel %vm246_vm1, %v350_v12, %v313_v57 }
  0xab   :  { %v343_v11 = vsel %vm246_vm1, %v342_v7, %v301_v55 }
  0xb0   :  { %371 = vrot.lane.b32.xlu1 %v351_v16, %s558_s21 }
  0xb1   :  { %379 = vrot.lane.b32.xlu2 %v355_v19, %s560_s23 }
  0xb2   :  { %363 = vrot.lane.b32.xlu0 %v347_v18, %s559_s22 }
  0xba   :  { %383 = vrot.lane.b32.xlu0 %v357_v21, %s561_s24 }
 0x103   :  { %v376_v32 = vpop.permute.xlu2 %375 }
 0x10b   :  { %v380_v40 = vpop.permute.xlu2 %379 }
 0x11a   :  { %v368_v30 = vpop.permute.xlu1 %367 }
 0x11c   :  { %v360_v31 = vpop.permute.xlu0 %359 }
 0x11d   :  { %v387_v33 = vsel %vm386_vm2, %v343_v11, %v360_v31 }
 0x122   :  { %v372_v36 = vpop.permute.xlu1 %371 }
 0x124   :  { %v364_v34 = vpop.permute.xlu0 %363 }
 0x125   :  { %v389_v35 = vsel %vm388_vm3, %v387_v33, %v364_v34 }
 0x126   :  { %v391_v37 = vsel %vm390_vm4, %v389_v35, %v368_v30 }
 0x127   :  { %v392_v38 = vsel %vm60_vm0, %v391_v37, %v372_v36 }
 0x128   :  { %v394_v39 = vsel %vm393_vm5, %v392_v38, %v376_v32 }
 0x129   :  { %v396_v42 = vsel %vm395_vm6, %v394_v39, %v380_v40 }
 0x12c   :  { %v384_v41 = vpop.permute.xlu0 %383 }
 0x12d   :  { %v398_v43 = vsel %vm397_vm7, %v396_v42, %v384_v41 }
 0x12e   :  { %458 = vmatmul.msk.f32.vlgmr.msrb.gmra.mxu0 %vm399_vm8, %v398_v43 }
 0x1ab   :  { %v420_v44 = vpop.f32.mrf.mxu0 }
 0x1ac   :  { %423 = vst [vmem:[#allocation7] sm:$0xff] %v420_v44 }
 0x1ad   :  { %434 = dma.vmem_to_hbm [thread:$0]  %s430_s26, 128, %s432_s29, [#allocation4]  }
 0x1ae   :  { %548 = dma.done.wait [#allocation4], 128  }
 0x1af   :  { %549 = vsyncadd [#allocation4], 4294967168 }
 0x1b0   :  { %439 = vsyncpa [#allocation3], 1 }
 0x1b1   :  { %440 = vsyncpa [#allocation6], 1 }
 0x1b2   :  { %441 = vsyncpa [#allocation4], 1 }

// kernel: tpu_custom_call.1
= control target key start
LH: loop header
LB: loop body
LE: loop exit
PB: predicated region body
PF: predicated region fallthrough
CT: control target
= control target key end

     0   :  { %7 = vsyncpa [#allocation3], 0  ;;  %s631_s0 = inlined_call_operand.hbm [shape: f32[8,8,32], index: 0, kind: input, shape index: {}]   ;;  %s632_s1 = inlined_call_operand.hbm [shape: f32[64,128], index: 1, kind: input, shape index: {}]   ;;  %s633_s2 = inlined_call_operand.hbm [shape: f32[8,128], index: 2, kind: output, shape index: {}]  }
   0x1   :  { %8 = vsyncpa [#allocation6], 0 }
   0x2   :  { %9 = vsyncpa [#allocation4], 0  ;;  %s14_s11 = sshll.u32 %s631_s0, 4  ;;  %s550_s12 = smov [#allocation2]   ;;  %s15_s11 = int_to_ptr.hbm [resolvable:$true] %s14_s11 }
   0x3   :  { %s16_s13 = sshll.u32 %s550_s12, 4  ;;  %s27_s16 = sshll.u32 %s632_s1, 4  ;;  %s17_s13 = int_to_ptr.vmem [resolvable:$true] %s16_s13  ;;  %s28_s16 = int_to_ptr.hbm [resolvable:$true] %s27_s16 }
   0x4   :  { %s551_s17 = smov 128   ;;  %s552_s18 = smov 8  }
   0x5   :  { %22 = dma.hbm_to_vmem [thread:$0]  %s15_s11, 1024, %s17_s13, [#allocation3], %s551_s17, %s551_s17, %s552_s18  }
   0x6   :  { %s553_s19 = smov [#allocation5]  }
   0x7   :  { %s29_s20 = sshll.u32 %s553_s19, 4  ;;  %s30_s20 = int_to_ptr.vmem [resolvable:$true] %s29_s20 }
   0x8   :  { %35 = dma.hbm_to_vmem [thread:$0]  %s28_s16, 1024, %s30_s20, [#allocation6], %s551_s17, %s551_s17, %s552_s18  }
   0x9   :  { %544 = dma.done.wait [#allocation3], 1024  }
   0xa   :  { %545 = vsyncadd [#allocation3], 4294966272 }
   0xb   :  { %546 = dma.done.wait [#allocation6], 1024  }
   0xc   :  { %547 = vsyncadd [#allocation6], 4294966272  ;;  %vm60_vm0 = vcmask 261120   ;;  %v52_v0 = vld [vmem:[#allocation2] sm:$0xff]  ;;  %v54_v1 = vld [vmem:[#allocation2 + $0x10] sm:$0xff]  ;;  %vm246_vm1 = vcmask 1047556  }
   0xd   :  { %v55_v2 = vld [vmem:[#allocation2 + $0x18] sm:$0xff]  ;;  %442 = vmatpush.xpose.msk.msra.mxu1 %vm60_vm0, %v52_v0  ;;  %446 = vmatpush.xpose.msk.msra.mxu2 %vm60_vm0, %v54_v1  ;;  %v53_v3 = vld [vmem:[#allocation2 + $0x8] sm:$0xff]  ;;  %v58_v5 = vld [vmem:[#allocation2 + $0x30] sm:$0xff]  ;;  %v554_v9 = vmov 1983009808   ;;  %s556_s0 = smov 24  }
   0xe   :  { %v59_v4 = vld [vmem:[#allocation2 + $0x38] sm:$0xff]  ;;  %448 = vmatpush.xpose.msk.msra.mxu3 %vm60_vm0, %v55_v2  ;;  %v57_v6 = vld [vmem:[#allocation2 + $0x28] sm:$0xff]  ;;  %v56_v7 = vld [vmem:[#allocation2 + $0x20] sm:$0xff]  ;;  %v251_v10 = vunpack.c.l.s4 %v554_v9  ;;  %v555_v22 = vmov 1934713408   ;;  %s557_s1 = smov 40  }
   0xf   :  { %450 = vmatpush.xpose.msk.msra.mxu0 %vm60_vm0, %v56_v7  ;;  %v299_v23 = vunpack.c.l.s4 %v555_v22  ;;  %s558_s21 = smov 32   ;;  %s559_s22 = smov 16   ;;  %v51_v22 = vld [vmem:[#allocation5 + $0x38] sm:$0xff]  ;;  %vm386_vm2 = vcmask 64512   ;;  %vm388_vm3 = vcmask 130048   ;;  %vm390_vm4 = vcmask 195584  }
  0x10   :  { %443 = vmatmul.msk.f32.vlgmr.msra.gmra.mxu1 %vm60_vm0, %v52_v0  ;;  %447 = vmatmul.msk.f32.vlgmr.msra.gmra.mxu2 %vm60_vm0, %v54_v1  ;;  %v252_v14 = vunpack.c.0.s8 %v251_v10  ;;  %s560_s23 = smov 48   ;;  %s561_s24 = smov 56   ;;  %vm393_vm5 = vcmask 326656   ;;  %vm395_vm6 = vcmask 392192   ;;  %vm397_vm7 = vcmask 457728  }
  0x11   :  { %444 = vmatpush.xpose.msk.msrb.mxu1 %vm60_vm0, %v53_v3  ;;  %454 = vmatpush.xpose.msk.msrb.mxu2 %vm60_vm0, %v58_v5  ;;  %v300_v37 = vunpack.c.0.s8 %v299_v23  ;;  %v50_v23 = vld [vmem:[#allocation5 + $0x30] sm:$0xff]  ;;  %vm399_vm8 = vcmask 523264   ;;  %s562_s25 = smov [#allocation7]   ;;  %s431_s29 = sshll.u32 %s633_s2, 4  ;;  %s432_s29 = int_to_ptr.hbm [resolvable:$true] %s431_s29 }
  0x12   :  { %456 = vmatpush.xpose.msk.msrb.mxu3 %vm60_vm0, %v59_v4  ;;  %451 = vmatmul.msk.f32.vlgmr.msra.gmra.mxu0 %vm60_vm0, %v56_v7  ;;  %s429_s26 = sshll.u32 %s562_s25, 4  ;;  %s430_s26 = int_to_ptr.vmem [resolvable:$true] %s429_s26 }
  0x13   :  { %449 = vmatmul.msk.f32.vlgmr.msra.gmra.mxu3 %vm60_vm0, %v55_v2  ;;  %411 = vmatpush.msrb.mxu0 %v51_v22 }
  0x15   :  { %452 = vmatpush.xpose.msk.msra.mxu1 %vm60_vm0, %v57_v6  ;;  %412 = vmatpush.msrb.mxu0 %v50_v23 }
  0x18   :  { %445 = vmatmul.msk.f32.vlgmr.msrb.gmra.mxu1 %vm60_vm0, %v53_v3  ;;  %455 = vmatmul.msk.f32.vlgmr.msrb.gmra.mxu2 %vm60_vm0, %v58_v5 }
  0x1b   :  { %457 = vmatmul.msk.f32.vlgmr.msrb.gmra.mxu3 %vm60_vm0, %v59_v4 }
  0x20   :  { %453 = vmatmul.msk.f32.vlgmr.msra.gmra.mxu1 %vm60_vm0, %v57_v6 }
  0x8d   :  { %v81_v8 = vpop.f32.mrf.mxu1 }
  0x8e   :  { %v248_v24 = vrot.slane %v81_v8, 4 }
  0x8f   :  { %v173_v17 = vpop.f32.mrf.mxu0 }
  0x90   :  { %v272_v27 = vrot.slane %v173_v17, 4 }
  0x93   :  { %v127_v11 = vpop.f32.mrf.mxu2 }
  0x94   :  { %v245_v12 = vrot.slane %v127_v11, 4  ;;  %v249_v30 = vsel %vm246_vm1, %v127_v11, %v248_v24  ;;  %v49_v24 = vld [vmem:[#allocation5 + $0x28] sm:$0xff] }
  0x95   :  { %v104_v16 = vpop.f32.mrf.mxu1  ;;  %v257_v38 = vperm.slane %v249_v30, %v252_v14  ;;  %413 = vmatpush.msrb.mxu0 %v49_v24 }
  0x96   :  { %v150_v13 = vpop.f32.mrf.mxu3  ;;  %v247_v18 = vsel %vm246_vm1, %v245_v12, %v81_v8  ;;  %v260_v19 = vrot.slane %v104_v16, 4 }
  0x97   :  { %v258_v15 = vrot.slane %v150_v13, 4  ;;  %v253_v20 = vperm.slane %v247_v18, %v252_v14  ;;  %v308_v10 = vrot.slane %v257_v38, 4 }
  0x98   :  { %v261_v25 = vsel %vm246_vm1, %v150_v13, %v260_v19 }
  0x99   :  { %v259_v21 = vsel %vm246_vm1, %v258_v15, %v104_v16  ;;  %v296_v28 = vrot.slane %v253_v20, 4  ;;  %v269_v29 = vperm.slane %v261_v25, %v252_v14  ;;  %v48_v25 = vld [vmem:[#allocation5 + $0x20] sm:$0xff] }
  0x9a   :  { %v265_v26 = vperm.slane %v259_v21, %v252_v14  ;;  %414 = vmatpush.msrb.mxu0 %v48_v25 }
  0x9b   :  { %v306_v32 = vrot.slane %v269_v29, 4  ;;  %v219_v33 = vpop.f32.mrf.mxu2 }
  0x9c   :  { %v294_v31 = vrot.slane %v265_v26, 4  ;;  %v270_v34 = vrot.slane %v219_v33, 4  ;;  %v273_v35 = vsel %vm246_vm1, %v219_v33, %v272_v27  ;;  %v297_v39 = vsel %vm246_vm1, %v265_v26, %v296_v28  ;;  %v47_v26 = vld [vmem:[#allocation5 + $0x18] sm:$0xff]  ;;  %v46_v27 = vld [vmem:[#allocation5 + $0x10] sm:$0xff]  ;;  %v45_v28 = vld [vmem:[#allocation5 + $0x8] sm:$0xff] }
  0x9d   :  { %v281_v40 = vperm.slane %v273_v35, %v252_v14  ;;  %v196_v42 = vpop.f32.mrf.mxu1  ;;  %v307_v48 = vsel %vm246_vm1, %v306_v32, %v257_v38  ;;  %v305_v51 = vperm.slane %v297_v39, %v300_v37  ;;  %415 = vmatpush.msrb.mxu0 %v47_v26 }
  0x9e   :  { %v242_v36 = vpop.f32.mrf.mxu3  ;;  %v271_v43 = vsel %vm246_vm1, %v270_v34, %v173_v17  ;;  %v284_v44 = vrot.slane %v196_v42, 4  ;;  %v295_v45 = vsel %vm246_vm1, %v294_v31, %v253_v20  ;;  %v313_v57 = vperm.slane %v307_v48, %v300_v37 }
  0x9f   :  { %v282_v41 = vrot.slane %v242_v36, 4  ;;  %v277_v46 = vperm.slane %v271_v43, %v252_v14  ;;  %v332_v53 = vrot.slane %v281_v40, 4  ;;  %v301_v55 = vperm.slane %v295_v45, %v300_v37  ;;  %416 = vmatpush.msrb.mxu0 %v46_v27 }
  0xa0   :  { %v285_v49 = vsel %vm246_vm1, %v242_v36, %v284_v44  ;;  %v348_v61 = vrot.slane %v305_v51, 4  ;;  %v352_v5 = vrot.slane %v313_v57, 4 }
  0xa1   :  { %v283_v47 = vsel %vm246_vm1, %v282_v41, %v196_v42  ;;  %v320_v52 = vrot.slane %v277_v46, 4  ;;  %v293_v54 = vperm.slane %v285_v49, %v252_v14  ;;  %v344_v0 = vrot.slane %v301_v55, 4  ;;  %417 = vmatpush.msrb.mxu0 %v45_v28 }
  0xa2   :  { %v289_v50 = vperm.slane %v283_v47, %v252_v14  ;;  %v309_v14 = vsel %vm246_vm1, %v269_v29, %v308_v10  ;;  %v44_v29 = vld [vmem:[#allocation5] sm:$0xff] }
  0xa3   :  { %v330_v58 = vrot.slane %v293_v54, 4  ;;  %v333_v2 = vsel %vm246_vm1, %v293_v54, %v332_v53  ;;  %v317_v17 = vperm.slane %v309_v14, %v300_v37  ;;  %418 = vmatpush.msrb.mxu0 %v44_v29 }
  0xa4   :  { %v318_v56 = vrot.slane %v289_v50, 4  ;;  %v321_v59 = vsel %vm246_vm1, %v289_v50, %v320_v52  ;;  %v341_v9 = vperm.slane %v333_v2, %v300_v37 }
  0xa5   :  { %v329_v60 = vperm.slane %v321_v59, %v300_v37  ;;  %v331_v1 = vsel %vm246_vm1, %v330_v58, %v281_v40  ;;  %v356_v20 = vrot.slane %v317_v17, 4 }
  0xa6   :  { %v319_v62 = vsel %vm246_vm1, %v318_v56, %v277_v46  ;;  %v337_v4 = vperm.slane %v331_v1, %v300_v37  ;;  %v354_v15 = vrot.slane %v341_v9, 4 }
  0xa7   :  { %v325_v63 = vperm.slane %v319_v62, %v300_v37  ;;  %v349_v3 = vsel %vm246_vm1, %v329_v60, %v348_v61  ;;  %v346_v13 = vrot.slane %v329_v60, 4  ;;  %v357_v21 = vsel %vm246_vm1, %v341_v9, %v356_v20 }
  0xa8   :  { %367 = vrot.lane.b32.xlu1 %v349_v3, %s556_s0  ;;  %v353_v8 = vsel %vm246_vm1, %v337_v4, %v352_v5  ;;  %v350_v12 = vrot.slane %v337_v4, 4  ;;  %v355_v19 = vsel %vm246_vm1, %v354_v15, %v317_v17 }
  0xa9   :  { %v345_v6 = vsel %vm246_vm1, %v325_v63, %v344_v0  ;;  %v342_v7 = vrot.slane %v325_v63, 4  ;;  %375 = vrot.lane.b32.xlu2 %v353_v8, %s557_s1  ;;  %v347_v18 = vsel %vm246_vm1, %v346_v13, %v305_v51 }
  0xaa   :  { %359 = vrot.lane.b32.xlu0 %v345_v6, %s552_s18  ;;  %v351_v16 = vsel %vm246_vm1, %v350_v12, %v313_v57 }
  0xab   :  { %v343_v11 = vsel %vm246_vm1, %v342_v7, %v301_v55 }
  0xb0   :  { %371 = vrot.lane.b32.xlu1 %v351_v16, %s558_s21 }
  0xb1   :  { %379 = vrot.lane.b32.xlu2 %v355_v19, %s560_s23 }
  0xb2   :  { %363 = vrot.lane.b32.xlu0 %v347_v18, %s559_s22 }
  0xba   :  { %383 = vrot.lane.b32.xlu0 %v357_v21, %s561_s24 }
 0x103   :  { %v376_v32 = vpop.permute.xlu2 %375 }
 0x10b   :  { %v380_v40 = vpop.permute.xlu2 %379 }
 0x11a   :  { %v368_v30 = vpop.permute.xlu1 %367 }
 0x11c   :  { %v360_v31 = vpop.permute.xlu0 %359 }
 0x11d   :  { %v387_v33 = vsel %vm386_vm2, %v343_v11, %v360_v31 }
 0x122   :  { %v372_v36 = vpop.permute.xlu1 %371 }
 0x124   :  { %v364_v34 = vpop.permute.xlu0 %363 }
 0x125   :  { %v389_v35 = vsel %vm388_vm3, %v387_v33, %v364_v34 }
 0x126   :  { %v391_v37 = vsel %vm390_vm4, %v389_v35, %v368_v30 }
 0x127   :  { %v392_v38 = vsel %vm60_vm0, %v391_v37, %v372_v36 }
 0x128   :  { %v394_v39 = vsel %vm393_vm5, %v392_v38, %v376_v32 }
 0x129   :  { %v396_v42 = vsel %vm395_vm6, %v394_v39, %v380_v40 }
 0x12c   :  { %v384_v41 = vpop.permute.xlu0 %383 }
 0x12d   :  { %v398_v43 = vsel %vm397_vm7, %v396_v42, %v384_v41 }
 0x12e   :  { %458 = vmatmul.msk.f32.vlgmr.msrb.gmra.mxu0 %vm399_vm8, %v398_v43 }
 0x1ab   :  { %v420_v44 = vpop.f32.mrf.mxu0 }
 0x1ac   :  { %423 = vst [vmem:[#allocation7] sm:$0xff] %v420_v44 }
 0x1ad   :  { %434 = dma.vmem_to_hbm [thread:$0]  %s430_s26, 128, %s432_s29, [#allocation4]  }
 0x1ae   :  { %548 = dma.done.wait [#allocation4], 128  }
 0x1af   :  { %549 = vsyncadd [#allocation4], 4294967168 }
 0x1b0   :  { %439 = vsyncpa [#allocation3], 1 }
 0x1b1   :  { %440 = vsyncpa [#allocation6], 1 }
 0x1b2   :  { %441 = vsyncpa [#allocation4], 1 }

</bundles_post_ra>
